<compile_context>
chip_gen: v7x
topology: tpu7x:2x2x1
jax: 0.10.0
libtpu: 0.0.40
codegen_flags: <defaults>
</compile_context>

<pallas_src>
import jax
import jax.numpy as jnp
from jax import lax
from jax.experimental import pallas as pl
from jax.experimental.pallas import tpu as pltpu


def _aux_fused_kernel(p_ref, w1_ref, s1_ref, w2_ref, s2_ref, o_ref):
    """Per-image fused conv1x1+BN+ReLU -> conv2x2(4 taps)+BN+ReLU.

    p_ref : (1, H1, W1, C_in)   pooled activations (NHWC, sum-pool, f32)
    w1_ref: (C_in, C_b)         1x1 conv weight, BN1 scale and 1/25 folded in
    s1_ref: (1, C_b)            BN1 shift
    w2_ref: (2, 2, C_b, C_out)  2x2 conv weight, BN2 scale folded in
    s2_ref: (1, C_out)          BN2 shift
    o_ref : (1, H2, W2, C_out)  output (NHWC, f32)
    """
    w1 = w1_ref[...]
    s1 = s1_ref[...]
    s2 = s2_ref[...]

    H1, W1 = p_ref.shape[1], p_ref.shape[2]
    H2, W2 = o_ref.shape[1], o_ref.shape[2]

    # Stage 1: 1x1 conv + BN + ReLU, one pooled row at a time.  h1 stays in
    # vregs/VMEM — it is never written to HBM.  (Static unroll over H1 is fine:
    # auxiliary heads operate on small pooled feature maps.)
    h1_rows = []
    for h in range(H1):
        row = p_ref[0, h]                                          # (W1, C_in)
        acc = jnp.dot(row, w1, preferred_element_type=jnp.float32)
        h1_rows.append(jnp.maximum(acc + s1, 0.0))                 # (W1, C_b)

    # Stage 2: 2x2 conv as four accumulated taps (no im2col / concat),
    # + BN shift + ReLU, written row by row.
    w2_00 = w2_ref[0, 0]                                           # (C_b, C_out)
    w2_01 = w2_ref[0, 1]
    w2_10 = w2_ref[1, 0]
    w2_11 = w2_ref[1, 1]
    for h in range(H2):
        top = h1_rows[h]                                           # (W1, C_b)
        bot = h1_rows[h + 1]
        acc = jnp.dot(top[0:W2], w2_00, preferred_element_type=jnp.float32)
        acc = acc + jnp.dot(top[1:W1], w2_01, preferred_element_type=jnp.float32)
        acc = acc + jnp.dot(bot[0:W2], w2_10, preferred_element_type=jnp.float32)
        acc = acc + jnp.dot(bot[1:W1], w2_11, preferred_element_type=jnp.float32)
        o_ref[0, h] = jnp.maximum(acc + s2, 0.0)                   # (W2, C_out)


def auxiliary_module_forward(x, w1, g1, b1, m1, v1, w2, g2, b2, m2, v2,
                             *, eps=1e-5):
    """x: (N, C_in, H, W) NCHW.  w1: (C_b, C_in, 1, 1).  w2: (C_out, C_b, 2, 2)."""
    N, C_in, H, W = x.shape
    C_b = w1.shape[0]
    C_out = w2.shape[0]
    H1 = (H - 5) // 2 + 1
    W1 = (W - 5) // 2 + 1
    H2, W2 = H1 - 1, W1 - 1

    x = x.astype(jnp.float32)

    # ---- glue (tiny, one XLA fusion): ReLU + separable 5x5/stride-2 SUM-pool
    # in NCHW (W stays in lanes).  padding=0 -> every window is full, so the
    # 1/25 average divisor can be folded into the conv1 weight below.
    r = jnp.maximum(x, 0.0)
    s = lax.reduce_window(r, 0.0, lax.add, (1, 1, 5, 1), (1, 1, 2, 1), 'VALID')
    s = lax.reduce_window(s, 0.0, lax.add, (1, 1, 1, 5), (1, 1, 1, 2), 'VALID')
    pooled = jnp.transpose(s, (0, 2, 3, 1))            # (N, H1, W1, C_in), tiny

    # ---- fold BN (eval mode) + 1/25 into the conv weights / shifts.
    scale1 = g1 / jnp.sqrt(v1 + eps)
    shift1 = b1 - m1 * scale1
    scale2 = g2 / jnp.sqrt(v2 + eps)
    shift2 = b2 - m2 * scale2

    w1m = (w1.reshape(C_b, C_in).T * (scale1 / 25.0)[None, :]).astype(jnp.float32)
    s1m = shift1.reshape(1, C_b).astype(jnp.float32)
    w2m = (jnp.transpose(w2, (2, 3, 1, 0))
           * scale2[None, None, None, :]).astype(jnp.float32)      # (2,2,C_b,C_out)
    s2m = shift2.reshape(1, C_out).astype(jnp.float32)

    out_nhwc = pl.pallas_call(
        _aux_fused_kernel,
        out_shape=jax.ShapeDtypeStruct((N, H2, W2, C_out), jnp.float32),
        grid=(N,),
        in_specs=[
            pl.BlockSpec((1, H1, W1, C_in), lambda n: (n, 0, 0, 0)),
            pl.BlockSpec((C_in, C_b), lambda n: (0, 0)),
            pl.BlockSpec((1, C_b), lambda n: (0, 0)),
            pl.BlockSpec((2, 2, C_b, C_out), lambda n: (0, 0, 0, 0)),
            pl.BlockSpec((1, C_out), lambda n: (0, 0)),
        ],
        out_specs=pl.BlockSpec((1, H2, W2, C_out), lambda n: (n, 0, 0, 0)),
        compiler_params=pltpu.CompilerParams(
            dimension_semantics=("parallel",),
            vmem_limit_bytes=16 * 1024 * 1024,   # per-step footprint is a few KiB
        ),
    )(pooled, w1m, s1m, w2m, s2m)

    # NHWC -> NCHW on the tiny final output to match the PyTorch module.
    return jnp.transpose(out_nhwc, (0, 3, 1, 2))


def _reference(x, w1, g1, b1, m1, v1, w2, g2, b2, m2, v2, eps=1e-5):
    r = jnp.maximum(x, 0.0)
    pooled = lax.reduce_window(r, 0.0, lax.add,
                               (1, 1, 5, 5), (1, 1, 2, 2), 'VALID') / 25.0
    y = lax.conv_general_dilated(pooled, w1, (1, 1), 'VALID',
                                 dimension_numbers=('NCHW', 'OIHW', 'NCHW'))
    s1 = g1 / jnp.sqrt(v1 + eps)
    y = jnp.maximum(y * s1[None, :, None, None]
                    + (b1 - m1 * s1)[None, :, None, None], 0.0)
    y = lax.conv_general_dilated(y, w2, (1, 1), 'VALID',
                                 dimension_numbers=('NCHW', 'OIHW', 'NCHW'))
    s2 = g2 / jnp.sqrt(v2 + eps)
    y = jnp.maximum(y * s2[None, :, None, None]
                    + (b2 - m2 * s2)[None, :, None, None], 0.0)
    return y


if __name__ == "__main__":
    # AuxiliaryModule(in_channels=4, base_channels=8, out_channels=16)
    N, C_in, H, W = 2, 4, 16, 16
    C_b, C_out = 8, 16

    key = jax.random.PRNGKey(0)
    ks = jax.random.split(key, 11)

    x = jax.random.normal(ks[0], (N, C_in, H, W), dtype=jnp.float32)
    w1 = jax.random.normal(ks[1], (C_b, C_in, 1, 1), dtype=jnp.float32) * 0.1
    g1 = jax.random.normal(ks[2], (C_b,), dtype=jnp.float32) * 0.1 + 1.0
    b1 = jax.random.normal(ks[3], (C_b,), dtype=jnp.float32) * 0.1
    m1 = jax.random.normal(ks[4], (C_b,), dtype=jnp.float32) * 0.1
    v1 = jax.random.uniform(ks[5], (C_b,), dtype=jnp.float32, minval=0.5, maxval=1.5)
    w2 = jax.random.normal(ks[6], (C_out, C_b, 2, 2), dtype=jnp.float32) * 0.1
    g2 = jax.random.normal(ks[7], (C_out,), dtype=jnp.float32) * 0.1 + 1.0
    b2 = jax.random.normal(ks[8], (C_out,), dtype=jnp.float32) * 0.1
    m2 = jax.random.normal(ks[9], (C_out,), dtype=jnp.float32) * 0.1
    v2 = jax.random.uniform(ks[10], (C_out,), dtype=jnp.float32, minval=0.5, maxval=1.5)

    out = jax.jit(auxiliary_module_forward)(x, w1, g1, b1, m1, v1,
                                            w2, g2, b2, m2, v2)
    out = jax.block_until_ready(out)

    ref = _reference(x, w1, g1, b1, m1, v1, w2, g2, b2, m2, v2)

    H1 = (H - 5) // 2 + 1
    H2 = H1 - 1
    assert out.shape == (N, C_out, H2, H2), out.shape
    assert jnp.allclose(out, ref, atol=1e-2, rtol=1e-2), \
        float(jnp.max(jnp.abs(out - ref)))

    print("KERNEL_OK")
</pallas_src>

<mosaic_0001>
module attributes {stable_mosaic.version = 11 : i64} {
  func.func @_aux_fused_kernel(%arg0: i32, %arg1: memref<1x6x6x4xf32, #tpu.memory_space<vmem>>, %arg2: memref<4x8xf32, #tpu.memory_space<vmem>>, %arg3: memref<1x8xf32, #tpu.memory_space<vmem>>, %arg4: memref<2x2x8x16xf32, #tpu.memory_space<vmem>>, %arg5: memref<1x16xf32, #tpu.memory_space<vmem>>, %arg6: memref<1x5x5x16xf32, #tpu.memory_space<vmem>>) attributes {dimension_semantics = [#tpu.dimension_semantics<parallel>], iteration_bounds = array<i64: 2>, scalar_prefetch = 0 : i64, scratch_operands = 0 : i64, tpu.core_type = #tpu.core_type<tc>, window_params = [{transform_indices = @transform_0, window_bounds = array<i64: 1, 6, 6, 4>}, {pipeline_mode = #tpu.pipeline_mode<synchronous>, transform_indices = @transform_1, window_bounds = array<i64: 4, 8>}, {pipeline_mode = #tpu.pipeline_mode<synchronous>, transform_indices = @transform_2, window_bounds = array<i64: 1, 8>}, {pipeline_mode = #tpu.pipeline_mode<synchronous>, transform_indices = @transform_3, window_bounds = array<i64: 2, 2, 8, 16>}, {pipeline_mode = #tpu.pipeline_mode<synchronous>, transform_indices = @transform_4, window_bounds = array<i64: 1, 16>}, {transform_indices = @transform_5, window_bounds = array<i64: 1, 5, 5, 16>}]} {
    %c0 = arith.constant 0 : index
    %c0_0 = arith.constant 0 : index
    %0 = vector.load %arg2[%c0, %c0_0] : memref<4x8xf32, #tpu.memory_space<vmem>>, vector<4x8xf32>
    %c0_1 = arith.constant 0 : index
    %c0_2 = arith.constant 0 : index
    %1 = vector.load %arg3[%c0_1, %c0_2] : memref<1x8xf32, #tpu.memory_space<vmem>>, vector<1x8xf32>
    %c0_3 = arith.constant 0 : index
    %c0_4 = arith.constant 0 : index
    %2 = vector.load %arg5[%c0_3, %c0_4] : memref<1x16xf32, #tpu.memory_space<vmem>>, vector<1x16xf32>
    %c0_5 = arith.constant 0 : index
    %c0_6 = arith.constant 0 : index
    %c0_7 = arith.constant 0 : index
    %c0_8 = arith.constant 0 : index
    %3 = vector.load %arg1[%c0_5, %c0_6, %c0_7, %c0_8] : memref<1x6x6x4xf32, #tpu.memory_space<vmem>>, vector<1x1x6x4xf32>
    %4 = vector.shape_cast %3 : vector<1x1x6x4xf32> to vector<6x4xf32>
    %cst = arith.constant dense<0.000000e+00> : vector<6x8xf32>
    %5 = tpu.matmul %4, %0, %cst {dimension_numbers = #tpu.dot_dimension_numbers<[1], [0], [0], [1], [0, 0, 1, 1], [], []>} : vector<6x4xf32>, vector<4x8xf32>, vector<6x8xf32> -> vector<6x8xf32>
    %6 = vector.broadcast %1 : vector<1x8xf32> to vector<6x8xf32>
    %7 = arith.addf %5, %6 : vector<6x8xf32>
    %cst_9 = arith.constant 0.000000e+00 : f32
    %8 = vector.broadcast %cst_9 : f32 to vector<6x8xf32>
    %9 = arith.maximumf %7, %8 : vector<6x8xf32>
    %c0_10 = arith.constant 0 : index
    %c1 = arith.constant 1 : index
    %c0_11 = arith.constant 0 : index
    %c0_12 = arith.constant 0 : index
    %10 = vector.load %arg1[%c0_10, %c1, %c0_11, %c0_12] : memref<1x6x6x4xf32, #tpu.memory_space<vmem>>, vector<1x1x6x4xf32>
    %11 = vector.shape_cast %10 : vector<1x1x6x4xf32> to vector<6x4xf32>
    %cst_13 = arith.constant dense<0.000000e+00> : vector<6x8xf32>
    %12 = tpu.matmul %11, %0, %cst_13 {dimension_numbers = #tpu.dot_dimension_numbers<[1], [0], [0], [1], [0, 0, 1, 1], [], []>} : vector<6x4xf32>, vector<4x8xf32>, vector<6x8xf32> -> vector<6x8xf32>
    %13 = vector.broadcast %1 : vector<1x8xf32> to vector<6x8xf32>
    %14 = arith.addf %12, %13 : vector<6x8xf32>
    %cst_14 = arith.constant 0.000000e+00 : f32
    %15 = vector.broadcast %cst_14 : f32 to vector<6x8xf32>
    %16 = arith.maximumf %14, %15 : vector<6x8xf32>
    %c0_15 = arith.constant 0 : index
    %c2 = arith.constant 2 : index
    %c0_16 = arith.constant 0 : index
    %c0_17 = arith.constant 0 : index
    %17 = vector.load %arg1[%c0_15, %c2, %c0_16, %c0_17] : memref<1x6x6x4xf32, #tpu.memory_space<vmem>>, vector<1x1x6x4xf32>
    %18 = vector.shape_cast %17 : vector<1x1x6x4xf32> to vector<6x4xf32>
    %cst_18 = arith.constant dense<0.000000e+00> : vector<6x8xf32>
    %19 = tpu.matmul %18, %0, %cst_18 {dimension_numbers = #tpu.dot_dimension_numbers<[1], [0], [0], [1], [0, 0, 1, 1], [], []>} : vector<6x4xf32>, vector<4x8xf32>, vector<6x8xf32> -> vector<6x8xf32>
    %20 = vector.broadcast %1 : vector<1x8xf32> to vector<6x8xf32>
    %21 = arith.addf %19, %20 : vector<6x8xf32>
    %cst_19 = arith.constant 0.000000e+00 : f32
    %22 = vector.broadcast %cst_19 : f32 to vector<6x8xf32>
    %23 = arith.maximumf %21, %22 : vector<6x8xf32>
    %c0_20 = arith.constant 0 : index
    %c3 = arith.constant 3 : index
    %c0_21 = arith.constant 0 : index
    %c0_22 = arith.constant 0 : index
    %24 = vector.load %arg1[%c0_20, %c3, %c0_21, %c0_22] : memref<1x6x6x4xf32, #tpu.memory_space<vmem>>, vector<1x1x6x4xf32>
    %25 = vector.shape_cast %24 : vector<1x1x6x4xf32> to vector<6x4xf32>
    %cst_23 = arith.constant dense<0.000000e+00> : vector<6x8xf32>
    %26 = tpu.matmul %25, %0, %cst_23 {dimension_numbers = #tpu.dot_dimension_numbers<[1], [0], [0], [1], [0, 0, 1, 1], [], []>} : vector<6x4xf32>, vector<4x8xf32>, vector<6x8xf32> -> vector<6x8xf32>
    %27 = vector.broadcast %1 : vector<1x8xf32> to vector<6x8xf32>
    %28 = arith.addf %26, %27 : vector<6x8xf32>
    %cst_24 = arith.constant 0.000000e+00 : f32
    %29 = vector.broadcast %cst_24 : f32 to vector<6x8xf32>
    %30 = arith.maximumf %28, %29 : vector<6x8xf32>
    %c0_25 = arith.constant 0 : index
    %c4 = arith.constant 4 : index
    %c0_26 = arith.constant 0 : index
    %c0_27 = arith.constant 0 : index
    %31 = vector.load %arg1[%c0_25, %c4, %c0_26, %c0_27] : memref<1x6x6x4xf32, #tpu.memory_space<vmem>>, vector<1x1x6x4xf32>
    %32 = vector.shape_cast %31 : vector<1x1x6x4xf32> to vector<6x4xf32>
    %cst_28 = arith.constant dense<0.000000e+00> : vector<6x8xf32>
    %33 = tpu.matmul %32, %0, %cst_28 {dimension_numbers = #tpu.dot_dimension_numbers<[1], [0], [0], [1], [0, 0, 1, 1], [], []>} : vector<6x4xf32>, vector<4x8xf32>, vector<6x8xf32> -> vector<6x8xf32>
    %34 = vector.broadcast %1 : vector<1x8xf32> to vector<6x8xf32>
    %35 = arith.addf %33, %34 : vector<6x8xf32>
    %cst_29 = arith.constant 0.000000e+00 : f32
    %36 = vector.broadcast %cst_29 : f32 to vector<6x8xf32>
    %37 = arith.maximumf %35, %36 : vector<6x8xf32>
    %c0_30 = arith.constant 0 : index
    %c5 = arith.constant 5 : index
    %c0_31 = arith.constant 0 : index
    %c0_32 = arith.constant 0 : index
    %38 = vector.load %arg1[%c0_30, %c5, %c0_31, %c0_32] : memref<1x6x6x4xf32, #tpu.memory_space<vmem>>, vector<1x1x6x4xf32>
    %39 = vector.shape_cast %38 : vector<1x1x6x4xf32> to vector<6x4xf32>
    %cst_33 = arith.constant dense<0.000000e+00> : vector<6x8xf32>
    %40 = tpu.matmul %39, %0, %cst_33 {dimension_numbers = #tpu.dot_dimension_numbers<[1], [0], [0], [1], [0, 0, 1, 1], [], []>} : vector<6x4xf32>, vector<4x8xf32>, vector<6x8xf32> -> vector<6x8xf32>
    %41 = vector.broadcast %1 : vector<1x8xf32> to vector<6x8xf32>
    %42 = arith.addf %40, %41 : vector<6x8xf32>
    %cst_34 = arith.constant 0.000000e+00 : f32
    %43 = vector.broadcast %cst_34 : f32 to vector<6x8xf32>
    %44 = arith.maximumf %42, %43 : vector<6x8xf32>
    %c0_35 = arith.constant 0 : index
    %c0_36 = arith.constant 0 : index
    %c0_37 = arith.constant 0 : index
    %c0_38 = arith.constant 0 : index
    %45 = vector.load %arg4[%c0_35, %c0_36, %c0_37, %c0_38] : memref<2x2x8x16xf32, #tpu.memory_space<vmem>>, vector<1x1x8x16xf32>
    %46 = vector.shape_cast %45 : vector<1x1x8x16xf32> to vector<8x16xf32>
    %c0_39 = arith.constant 0 : index
    %c1_40 = arith.constant 1 : index
    %c0_41 = arith.constant 0 : index
    %c0_42 = arith.constant 0 : index
    %47 = vector.load %arg4[%c0_39, %c1_40, %c0_41, %c0_42] : memref<2x2x8x16xf32, #tpu.memory_space<vmem>>, vector<1x1x8x16xf32>
    %48 = vector.shape_cast %47 : vector<1x1x8x16xf32> to vector<8x16xf32>
    %c1_43 = arith.constant 1 : index
    %c0_44 = arith.constant 0 : index
    %c0_45 = arith.constant 0 : index
    %c0_46 = arith.constant 0 : index
    %49 = vector.load %arg4[%c1_43, %c0_44, %c0_45, %c0_46] : memref<2x2x8x16xf32, #tpu.memory_space<vmem>>, vector<1x1x8x16xf32>
    %50 = vector.shape_cast %49 : vector<1x1x8x16xf32> to vector<8x16xf32>
    %c1_47 = arith.constant 1 : index
    %c1_48 = arith.constant 1 : index
    %c0_49 = arith.constant 0 : index
    %c0_50 = arith.constant 0 : index
    %51 = vector.load %arg4[%c1_47, %c1_48, %c0_49, %c0_50] : memref<2x2x8x16xf32, #tpu.memory_space<vmem>>, vector<1x1x8x16xf32>
    %52 = vector.shape_cast %51 : vector<1x1x8x16xf32> to vector<8x16xf32>
    %53 = vector.extract_strided_slice %9 {offsets = [0, 0], sizes = [5, 8], strides = [1, 1]} : vector<6x8xf32> to vector<5x8xf32>
    %cst_51 = arith.constant dense<0.000000e+00> : vector<5x16xf32>
    %54 = tpu.matmul %53, %46, %cst_51 {dimension_numbers = #tpu.dot_dimension_numbers<[1], [0], [0], [1], [0, 0, 1, 1], [], []>} : vector<5x8xf32>, vector<8x16xf32>, vector<5x16xf32> -> vector<5x16xf32>
    %55 = vector.extract_strided_slice %9 {offsets = [1, 0], sizes = [5, 8], strides = [1, 1]} : vector<6x8xf32> to vector<5x8xf32>
    %cst_52 = arith.constant dense<0.000000e+00> : vector<5x16xf32>
    %56 = tpu.matmul %55, %48, %cst_52 {dimension_numbers = #tpu.dot_dimension_numbers<[1], [0], [0], [1], [0, 0, 1, 1], [], []>} : vector<5x8xf32>, vector<8x16xf32>, vector<5x16xf32> -> vector<5x16xf32>
    %57 = arith.addf %54, %56 : vector<5x16xf32>
    %58 = vector.extract_strided_slice %16 {offsets = [0, 0], sizes = [5, 8], strides = [1, 1]} : vector<6x8xf32> to vector<5x8xf32>
    %cst_53 = arith.constant dense<0.000000e+00> : vector<5x16xf32>
    %59 = tpu.matmul %58, %50, %cst_53 {dimension_numbers = #tpu.dot_dimension_numbers<[1], [0], [0], [1], [0, 0, 1, 1], [], []>} : vector<5x8xf32>, vector<8x16xf32>, vector<5x16xf32> -> vector<5x16xf32>
    %60 = arith.addf %57, %59 : vector<5x16xf32>
    %61 = vector.extract_strided_slice %16 {offsets = [1, 0], sizes = [5, 8], strides = [1, 1]} : vector<6x8xf32> to vector<5x8xf32>
    %cst_54 = arith.constant dense<0.000000e+00> : vector<5x16xf32>
    %62 = tpu.matmul %61, %52, %cst_54 {dimension_numbers = #tpu.dot_dimension_numbers<[1], [0], [0], [1], [0, 0, 1, 1], [], []>} : vector<5x8xf32>, vector<8x16xf32>, vector<5x16xf32> -> vector<5x16xf32>
    %63 = arith.addf %60, %62 : vector<5x16xf32>
    %64 = vector.broadcast %2 : vector<1x16xf32> to vector<5x16xf32>
    %65 = arith.addf %63, %64 : vector<5x16xf32>
    %cst_55 = arith.constant 0.000000e+00 : f32
    %66 = vector.broadcast %cst_55 : f32 to vector<5x16xf32>
    %67 = arith.maximumf %65, %66 : vector<5x16xf32>
    %c0_56 = arith.constant 0 : index
    %c0_57 = arith.constant 0 : index
    %c0_58 = arith.constant 0 : index
    %c0_59 = arith.constant 0 : index
    %68 = vector.load %arg6[%c0_56, %c0_57, %c0_58, %c0_59] : memref<1x5x5x16xf32, #tpu.memory_space<vmem>>, vector<1x1x5x16xf32>
    %69 = vector.shape_cast %68 : vector<1x1x5x16xf32> to vector<5x16xf32>
    %70 = vector.shape_cast %67 : vector<5x16xf32> to vector<1x1x5x16xf32>
    tpu.vector_store %arg6[%c0_56, %c0_57, %c0_58, %c0_59], %70 {strides = array<i32>} : memref<1x5x5x16xf32, #tpu.memory_space<vmem>>, vector<1x1x5x16xf32>,
    %71 = vector.extract_strided_slice %16 {offsets = [0, 0], sizes = [5, 8], strides = [1, 1]} : vector<6x8xf32> to vector<5x8xf32>
    %cst_60 = arith.constant dense<0.000000e+00> : vector<5x16xf32>
    %72 = tpu.matmul %71, %46, %cst_60 {dimension_numbers = #tpu.dot_dimension_numbers<[1], [0], [0], [1], [0, 0, 1, 1], [], []>} : vector<5x8xf32>, vector<8x16xf32>, vector<5x16xf32> -> vector<5x16xf32>
    %73 = vector.extract_strided_slice %16 {offsets = [1, 0], sizes = [5, 8], strides = [1, 1]} : vector<6x8xf32> to vector<5x8xf32>
    %cst_61 = arith.constant dense<0.000000e+00> : vector<5x16xf32>
    %74 = tpu.matmul %73, %48, %cst_61 {dimension_numbers = #tpu.dot_dimension_numbers<[1], [0], [0], [1], [0, 0, 1, 1], [], []>} : vector<5x8xf32>, vector<8x16xf32>, vector<5x16xf32> -> vector<5x16xf32>
    %75 = arith.addf %72, %74 : vector<5x16xf32>
    %76 = vector.extract_strided_slice %23 {offsets = [0, 0], sizes = [5, 8], strides = [1, 1]} : vector<6x8xf32> to vector<5x8xf32>
    %cst_62 = arith.constant dense<0.000000e+00> : vector<5x16xf32>
    %77 = tpu.matmul %76, %50, %cst_62 {dimension_numbers = #tpu.dot_dimension_numbers<[1], [0], [0], [1], [0, 0, 1, 1], [], []>} : vector<5x8xf32>, vector<8x16xf32>, vector<5x16xf32> -> vector<5x16xf32>
    %78 = arith.addf %75, %77 : vector<5x16xf32>
    %79 = vector.extract_strided_slice %23 {offsets = [1, 0], sizes = [5, 8], strides = [1, 1]} : vector<6x8xf32> to vector<5x8xf32>
    %cst_63 = arith.constant dense<0.000000e+00> : vector<5x16xf32>
    %80 = tpu.matmul %79, %52, %cst_63 {dimension_numbers = #tpu.dot_dimension_numbers<[1], [0], [0], [1], [0, 0, 1, 1], [], []>} : vector<5x8xf32>, vector<8x16xf32>, vector<5x16xf32> -> vector<5x16xf32>
    %81 = arith.addf %78, %80 : vector<5x16xf32>
    %82 = vector.broadcast %2 : vector<1x16xf32> to vector<5x16xf32>
    %83 = arith.addf %81, %82 : vector<5x16xf32>
    %cst_64 = arith.constant 0.000000e+00 : f32
    %84 = vector.broadcast %cst_64 : f32 to vector<5x16xf32>
    %85 = arith.maximumf %83, %84 : vector<5x16xf32>
    %c0_65 = arith.constant 0 : index
    %c1_66 = arith.constant 1 : index
    %c0_67 = arith.constant 0 : index
    %c0_68 = arith.constant 0 : index
    %86 = vector.load %arg6[%c0_65, %c1_66, %c0_67, %c0_68] : memref<1x5x5x16xf32, #tpu.memory_space<vmem>>, vector<1x1x5x16xf32>
    %87 = vector.shape_cast %86 : vector<1x1x5x16xf32> to vector<5x16xf32>
    %88 = vector.shape_cast %85 : vector<5x16xf32> to vector<1x1x5x16xf32>
    tpu.vector_store %arg6[%c0_65, %c1_66, %c0_67, %c0_68], %88 {strides = array<i32>} : memref<1x5x5x16xf32, #tpu.memory_space<vmem>>, vector<1x1x5x16xf32>,
    %89 = vector.extract_strided_slice %23 {offsets = [0, 0], sizes = [5, 8], strides = [1, 1]} : vector<6x8xf32> to vector<5x8xf32>
    %cst_69 = arith.constant dense<0.000000e+00> : vector<5x16xf32>
    %90 = tpu.matmul %89, %46, %cst_69 {dimension_numbers = #tpu.dot_dimension_numbers<[1], [0], [0], [1], [0, 0, 1, 1], [], []>} : vector<5x8xf32>, vector<8x16xf32>, vector<5x16xf32> -> vector<5x16xf32>
    %91 = vector.extract_strided_slice %23 {offsets = [1, 0], sizes = [5, 8], strides = [1, 1]} : vector<6x8xf32> to vector<5x8xf32>
    %cst_70 = arith.constant dense<0.000000e+00> : vector<5x16xf32>
    %92 = tpu.matmul %91, %48, %cst_70 {dimension_numbers = #tpu.dot_dimension_numbers<[1], [0], [0], [1], [0, 0, 1, 1], [], []>} : vector<5x8xf32>, vector<8x16xf32>, vector<5x16xf32> -> vector<5x16xf32>
    %93 = arith.addf %90, %92 : vector<5x16xf32>
    %94 = vector.extract_strided_slice %30 {offsets = [0, 0], sizes = [5, 8], strides = [1, 1]} : vector<6x8xf32> to vector<5x8xf32>
    %cst_71 = arith.constant dense<0.000000e+00> : vector<5x16xf32>
    %95 = tpu.matmul %94, %50, %cst_71 {dimension_numbers = #tpu.dot_dimension_numbers<[1], [0], [0], [1], [0, 0, 1, 1], [], []>} : vector<5x8xf32>, vector<8x16xf32>, vector<5x16xf32> -> vector<5x16xf32>
    %96 = arith.addf %93, %95 : vector<5x16xf32>
    %97 = vector.extract_strided_slice %30 {offsets = [1, 0], sizes = [5, 8], strides = [1, 1]} : vector<6x8xf32> to vector<5x8xf32>
    %cst_72 = arith.constant dense<0.000000e+00> : vector<5x16xf32>
    %98 = tpu.matmul %97, %52, %cst_72 {dimension_numbers = #tpu.dot_dimension_numbers<[1], [0], [0], [1], [0, 0, 1, 1], [], []>} : vector<5x8xf32>, vector<8x16xf32>, vector<5x16xf32> -> vector<5x16xf32>
    %99 = arith.addf %96, %98 : vector<5x16xf32>
    %100 = vector.broadcast %2 : vector<1x16xf32> to vector<5x16xf32>
    %101 = arith.addf %99, %100 : vector<5x16xf32>
    %cst_73 = arith.constant 0.000000e+00 : f32
    %102 = vector.broadcast %cst_73 : f32 to vector<5x16xf32>
    %103 = arith.maximumf %101, %102 : vector<5x16xf32>
    %c0_74 = arith.constant 0 : index
    %c2_75 = arith.constant 2 : index
    %c0_76 = arith.constant 0 : index
    %c0_77 = arith.constant 0 : index
    %104 = vector.load %arg6[%c0_74, %c2_75, %c0_76, %c0_77] : memref<1x5x5x16xf32, #tpu.memory_space<vmem>>, vector<1x1x5x16xf32>
    %105 = vector.shape_cast %104 : vector<1x1x5x16xf32> to vector<5x16xf32>
    %106 = vector.shape_cast %103 : vector<5x16xf32> to vector<1x1x5x16xf32>
    tpu.vector_store %arg6[%c0_74, %c2_75, %c0_76, %c0_77], %106 {strides = array<i32>} : memref<1x5x5x16xf32, #tpu.memory_space<vmem>>, vector<1x1x5x16xf32>,
    %107 = vector.extract_strided_slice %30 {offsets = [0, 0], sizes = [5, 8], strides = [1, 1]} : vector<6x8xf32> to vector<5x8xf32>
    %cst_78 = arith.constant dense<0.000000e+00> : vector<5x16xf32>
    %108 = tpu.matmul %107, %46, %cst_78 {dimension_numbers = #tpu.dot_dimension_numbers<[1], [0], [0], [1], [0, 0, 1, 1], [], []>} : vector<5x8xf32>, vector<8x16xf32>, vector<5x16xf32> -> vector<5x16xf32>
    %109 = vector.extract_strided_slice %30 {offsets = [1, 0], sizes = [5, 8], strides = [1, 1]} : vector<6x8xf32> to vector<5x8xf32>
    %cst_79 = arith.constant dense<0.000000e+00> : vector<5x16xf32>
    %110 = tpu.matmul %109, %48, %cst_79 {dimension_numbers = #tpu.dot_dimension_numbers<[1], [0], [0], [1], [0, 0, 1, 1], [], []>} : vector<5x8xf32>, vector<8x16xf32>, vector<5x16xf32> -> vector<5x16xf32>
    %111 = arith.addf %108, %110 : vector<5x16xf32>
    %112 = vector.extract_strided_slice %37 {offsets = [0, 0], sizes = [5, 8], strides = [1, 1]} : vector<6x8xf32> to vector<5x8xf32>
    %cst_80 = arith.constant dense<0.000000e+00> : vector<5x16xf32>
    %113 = tpu.matmul %112, %50, %cst_80 {dimension_numbers = #tpu.dot_dimension_numbers<[1], [0], [0], [1], [0, 0, 1, 1], [], []>} : vector<5x8xf32>, vector<8x16xf32>, vector<5x16xf32> -> vector<5x16xf32>
    %114 = arith.addf %111, %113 : vector<5x16xf32>
    %115 = vector.extract_strided_slice %37 {offsets = [1, 0], sizes = [5, 8], strides = [1, 1]} : vector<6x8xf32> to vector<5x8xf32>
    %cst_81 = arith.constant dense<0.000000e+00> : vector<5x16xf32>
    %116 = tpu.matmul %115, %52, %cst_81 {dimension_numbers = #tpu.dot_dimension_numbers<[1], [0], [0], [1], [0, 0, 1, 1], [], []>} : vector<5x8xf32>, vector<8x16xf32>, vector<5x16xf32> -> vector<5x16xf32>
    %117 = arith.addf %114, %116 : vector<5x16xf32>
    %118 = vector.broadcast %2 : vector<1x16xf32> to vector<5x16xf32>
    %119 = arith.addf %117, %118 : vector<5x16xf32>
    %cst_82 = arith.constant 0.000000e+00 : f32
    %120 = vector.broadcast %cst_82 : f32 to vector<5x16xf32>
    %121 = arith.maximumf %119, %120 : vector<5x16xf32>
    %c0_83 = arith.constant 0 : index
    %c3_84 = arith.constant 3 : index
    %c0_85 = arith.constant 0 : index
    %c0_86 = arith.constant 0 : index
    %122 = vector.load %arg6[%c0_83, %c3_84, %c0_85, %c0_86] : memref<1x5x5x16xf32, #tpu.memory_space<vmem>>, vector<1x1x5x16xf32>
    %123 = vector.shape_cast %122 : vector<1x1x5x16xf32> to vector<5x16xf32>
    %124 = vector.shape_cast %121 : vector<5x16xf32> to vector<1x1x5x16xf32>
    tpu.vector_store %arg6[%c0_83, %c3_84, %c0_85, %c0_86], %124 {strides = array<i32>} : memref<1x5x5x16xf32, #tpu.memory_space<vmem>>, vector<1x1x5x16xf32>,
    %125 = vector.extract_strided_slice %37 {offsets = [0, 0], sizes = [5, 8], strides = [1, 1]} : vector<6x8xf32> to vector<5x8xf32>
    %cst_87 = arith.constant dense<0.000000e+00> : vector<5x16xf32>
    %126 = tpu.matmul %125, %46, %cst_87 {dimension_numbers = #tpu.dot_dimension_numbers<[1], [0], [0], [1], [0, 0, 1, 1], [], []>} : vector<5x8xf32>, vector<8x16xf32>, vector<5x16xf32> -> vector<5x16xf32>
    %127 = vector.extract_strided_slice %37 {offsets = [1, 0], sizes = [5, 8], strides = [1, 1]} : vector<6x8xf32> to vector<5x8xf32>
    %cst_88 = arith.constant dense<0.000000e+00> : vector<5x16xf32>
    %128 = tpu.matmul %127, %48, %cst_88 {dimension_numbers = #tpu.dot_dimension_numbers<[1], [0], [0], [1], [0, 0, 1, 1], [], []>} : vector<5x8xf32>, vector<8x16xf32>, vector<5x16xf32> -> vector<5x16xf32>
    %129 = arith.addf %126, %128 : vector<5x16xf32>
    %130 = vector.extract_strided_slice %44 {offsets = [0, 0], sizes = [5, 8], strides = [1, 1]} : vector<6x8xf32> to vector<5x8xf32>
    %cst_89 = arith.constant dense<0.000000e+00> : vector<5x16xf32>
    %131 = tpu.matmul %130, %50, %cst_89 {dimension_numbers = #tpu.dot_dimension_numbers<[1], [0], [0], [1], [0, 0, 1, 1], [], []>} : vector<5x8xf32>, vector<8x16xf32>, vector<5x16xf32> -> vector<5x16xf32>
    %132 = arith.addf %129, %131 : vector<5x16xf32>
    %133 = vector.extract_strided_slice %44 {offsets = [1, 0], sizes = [5, 8], strides = [1, 1]} : vector<6x8xf32> to vector<5x8xf32>
    %cst_90 = arith.constant dense<0.000000e+00> : vector<5x16xf32>
    %134 = tpu.matmul %133, %52, %cst_90 {dimension_numbers = #tpu.dot_dimension_numbers<[1], [0], [0], [1], [0, 0, 1, 1], [], []>} : vector<5x8xf32>, vector<8x16xf32>, vector<5x16xf32> -> vector<5x16xf32>
    %135 = arith.addf %132, %134 : vector<5x16xf32>
    %136 = vector.broadcast %2 : vector<1x16xf32> to vector<5x16xf32>
    %137 = arith.addf %135, %136 : vector<5x16xf32>
    %cst_91 = arith.constant 0.000000e+00 : f32
    %138 = vector.broadcast %cst_91 : f32 to vector<5x16xf32>
    %139 = arith.maximumf %137, %138 : vector<5x16xf32>
    %c0_92 = arith.constant 0 : index
    %c4_93 = arith.constant 4 : index
    %c0_94 = arith.constant 0 : index
    %c0_95 = arith.constant 0 : index
    %140 = vector.load %arg6[%c0_92, %c4_93, %c0_94, %c0_95] : memref<1x5x5x16xf32, #tpu.memory_space<vmem>>, vector<1x1x5x16xf32>
    %141 = vector.shape_cast %140 : vector<1x1x5x16xf32> to vector<5x16xf32>
    %142 = vector.shape_cast %139 : vector<5x16xf32> to vector<1x1x5x16xf32>
    tpu.vector_store %arg6[%c0_92, %c4_93, %c0_94, %c0_95], %142 {strides = array<i32>} : memref<1x5x5x16xf32, #tpu.memory_space<vmem>>, vector<1x1x5x16xf32>,
    return
  }
  func.func @transform_0(%arg0: i32) -> (i32, i32, i32, i32) {
    %c0_i32 = arith.constant 0 : i32
    %c0_i32_0 = arith.constant 0 : i32
    %c0_i32_1 = arith.constant 0 : i32
    %c0_i32_2 = arith.constant 0 : i32
    return %arg0, %c0_i32, %c0_i32_0, %c0_i32_1 : i32, i32, i32, i32
  }
  func.func @transform_1(%arg0: i32) -> (i32, i32) {
    %c0_i32 = arith.constant 0 : i32
    %c0_i32_0 = arith.constant 0 : i32
    %c0_i32_1 = arith.constant 0 : i32
    return %c0_i32, %c0_i32_0 : i32, i32
  }
  func.func @transform_2(%arg0: i32) -> (i32, i32) {
    %c0_i32 = arith.constant 0 : i32
    %c0_i32_0 = arith.constant 0 : i32
    %c0_i32_1 = arith.constant 0 : i32
    return %c0_i32, %c0_i32_0 : i32, i32
  }
  func.func @transform_3(%arg0: i32) -> (i32, i32, i32, i32) {
    %c0_i32 = arith.constant 0 : i32
    %c0_i32_0 = arith.constant 0 : i32
    %c0_i32_1 = arith.constant 0 : i32
    %c0_i32_2 = arith.constant 0 : i32
    %c0_i32_3 = arith.constant 0 : i32
    return %c0_i32, %c0_i32_0, %c0_i32_1, %c0_i32_2 : i32, i32, i32, i32
  }
  func.func @transform_4(%arg0: i32) -> (i32, i32) {
    %c0_i32 = arith.constant 0 : i32
    %c0_i32_0 = arith.constant 0 : i32
    %c0_i32_1 = arith.constant 0 : i32
    return %c0_i32, %c0_i32_0 : i32, i32
  }
  func.func @transform_5(%arg0: i32) -> (i32, i32, i32, i32) {
    %c0_i32 = arith.constant 0 : i32
    %c0_i32_0 = arith.constant 0 : i32
    %c0_i32_1 = arith.constant 0 : i32
    %c0_i32_2 = arith.constant 0 : i32
    return %arg0, %c0_i32, %c0_i32_0, %c0_i32_1 : i32, i32, i32, i32
  }
}

</mosaic_0001>

<bundles_post_ra>
// kernel: auxiliary_module_forward.1
= control target key start
LH: loop header
LB: loop body
LE: loop exit
PB: predicated region body
PF: predicated region fallthrough
CT: control target
= control target key end

     0   :  { %s2518_s18 = smov 0   ;;  %s2718_s0 = inlined_call_operand.vmem [shape: f32[2,6,6,4], index: 0, kind: input, shape index: {}]   ;;  %s2719_s1 = inlined_call_operand.vmem [shape: f32[4,8], index: 1, kind: input, shape index: {}]   ;;  %s2720_s2 = inlined_call_operand.vmem [shape: f32[1,8], index: 2, kind: input, shape index: {}]   ;;  %s2721_s3 = inlined_call_operand.vmem [shape: f32[2,2,8,16], index: 3, kind: input, shape index: {}]   ;;  %s2722_s4 = inlined_call_operand.vmem [shape: f32[1,16], index: 4, kind: input, shape index: {}]   ;;  %s2723_s5 = inlined_call_operand.vmem [shape: f32[2,5,5,16], index: 5, kind: output, shape index: {}]  }
   0x1 LB: > { %s2229_s19 = sadd.s32 4294967295, %s2484_s18   ;;  %p2233_p0 = scmp.ge.s32.totalorder %s2484_s18, 1  ;;  %s2484_s18 = sphi %s2518_s18, %s15_s18  }
   0x2   : > { %p187_p1 = scmp.lt.s32.totalorder %s2484_s18, 3 }
   0x4   : > { %p188_p2 = pnand %p2233_p0, %p187_p1 }
   0x5   : > { %v225_v0 = vld [vmem:[%s2719_s1] sm:$0xf] (!%p188_p2)  ;;  %vm239_vm0 = vcmask (!%p188_p2), 1043456   ;;  %p215_p3 = scmp.lt.s32.totalorder (!%p188_p2), %s2229_s19, 1  ;;  %v2486_v1 = vmov (!%p188_p2), 0.0   ;;  %vm2487_vm1 = vmmov (!%p188_p2), 0  }
   0x6   : > { %191 = sbr.rel (%p188_p2) target bundleno = 493 (0x1ed), region = 40  ;;  %2336 = vmatprep.subr.mxu0 (!%p188_p2), %v2486_v1  ;;  %2338 = vmatprep.mubr.msk.f32.mxu0 (!%p188_p2), %vm2487_vm1, %v2486_v1  ;;  %vm235_vm2 = vcmask (!%p188_p2), 31744   ;;  %v2574_v8 = vld [vmem:[%s2721_s3] sm:$0xff] (!%p188_p2)  ;;  %v2580_v9 = vld [vmem:[%s2721_s3 + $0x8] sm:$0xff] (!%p188_p2)  ;;  %vm703_vm3 = vcmask (!%p188_p2), 64512   ;;  %v2595_v19 = vld [vmem:[%s2721_s3 + $0x18] sm:$0xff] (!%p188_p2) }
   0x7   : > { %2337 = vmatpush3.msk.msra.mxu0 (!%p188_p2), %vm239_vm0, %v225_v0  ;;  %2341 = vmatprep.subr.mxu1 (!%p188_p2), %v2486_v1  ;;  %v2588_v10 = vld [vmem:[%s2720_s2] ss:$0 sm:$0xff] (!%p188_p2)  ;;  %v2601_v24 = vld [vmem:[%s2721_s3 + $0x10] sm:$0xff] (!%p188_p2)  ;;  %vm1004_vm4 = vcmask (!%p188_p2), 126976  }
   0x8   : > { %2342 = vmatpush3.msk.msra.mxu1 (!%p188_p2), %vm239_vm0, %v225_v0  ;;  %2343 = vmatprep.mubr.msk.f32.mxu1 (!%p188_p2), %vm2487_vm1, %v2486_v1  ;;  %v2261_v53 = vld [vmem:[%s2722_s4] ss:$0 sm:$0xff] (!%p188_p2) }
   0x9   : > { %2346 = vmatprep.subr.mxu0 (!%p188_p2), %v2486_v1  ;;  %2351 = vmatprep.subr.mxu1 (!%p188_p2), %v2486_v1 }
   0xd   : > { %s2725_s19 = smov (!%p215_p3, %s2229_s19), 1 }
   0xe   : > { %s2466_s22 = smul.u32 48, %s2725_s19 }
   0xf   : > { %s2467_s11 = smul.u32 40, %s2725_s19 }
  0x10   : > { %s219_s25 = scalar_lea.vmem %s2718_s0, %s2466_s22 }
  0x11   : > { %v228_v2 = vld [vmem:[%s219_s25] sm:$0x3f]  ;;  %v2239_v3 = vld [vmem:[%s219_s25 + $0x8] sm:$0x3f]  ;;  %v2242_v4 = vld [vmem:[%s219_s25 + $0x10] sm:$0x3f]  ;;  %s2703_s16 = scalar_lea.vmem %s2723_s5, %s2467_s11 }
  0x12   : > { %2339 = vmatmul.mubr.msk.f32.vlgmr.msra.gmra.mrb[0].mxu0 %vm235_vm2, %v228_v2  ;;  %2344 = vmatmul.mubr.msk.f32.vlgmr.msra.gmra.mrb[0].mxu1 %vm235_vm2, %v2239_v3  ;;  %v2245_v5 = vld [vmem:[%s219_s25 + $0x18] sm:$0x3f]  ;;  %v2248_v6 = vld [vmem:[%s219_s25 + $0x20] sm:$0x3f]  ;;  %v2251_v7 = vld [vmem:[%s219_s25 + $0x28] sm:$0x3f] }
  0x13   : > { %2347 = vmatpush3.msk.msra.mxu0 %vm239_vm0, %v225_v0  ;;  %2348 = vmatprep.mubr.msk.f32.mxu0 %vm2487_vm1, %v2486_v1 }
  0x14   : > { %2352 = vmatpush3.msk.msra.mxu1 %vm239_vm0, %v225_v0  ;;  %2353 = vmatprep.mubr.msk.f32.mxu1 %vm2487_vm1, %v2486_v1 }
  0x15   : > { %2356 = vmatprep.subr.mxu0 %v2486_v1  ;;  %2361 = vmatprep.subr.mxu1 %v2486_v1 }
  0x16   : > { %2349 = vmatmul.mubr.msk.f32.vlgmr.msra.gmra.mrb[2].mxu0 %vm235_vm2, %v2242_v4  ;;  %2354 = vmatmul.mubr.msk.f32.vlgmr.msra.gmra.mrb[2].mxu1 %vm235_vm2, %v2245_v5 }
  0x17   : > { %2357 = vmatpush3.msk.msra.mxu0 %vm239_vm0, %v225_v0  ;;  %2358 = vmatprep.mubr.msk.f32.mxu0 %vm2487_vm1, %v2486_v1 }
  0x18   : > { %2362 = vmatpush3.msk.msra.mxu1 %vm239_vm0, %v225_v0  ;;  %2363 = vmatprep.mubr.msk.f32.mxu1 %vm2487_vm1, %v2486_v1 }
  0x19   : > { %2366 = vmatprep.subr.mxu0 %v2486_v1  ;;  %2371 = vmatprep.subr.mxu1 %v2486_v1 }
  0x1a   : > { %2359 = vmatmul.mubr.msk.f32.vlgmr.msra.gmra.mrb[4].mxu0 %vm235_vm2, %v2248_v6  ;;  %2364 = vmatmul.mubr.msk.f32.vlgmr.msra.gmra.mrb[4].mxu1 %vm235_vm2, %v2251_v7 }
  0x1b   : > { %2373 = vmatprep.mubr.msk.f32.mxu1 %vm2487_vm1, %v2486_v1  ;;  %2368 = vmatprep.mubr.msk.f32.mxu0 %vm2487_vm1, %v2486_v1 }
  0x1c   : > { %2372 = vmatpush3.msra.mxu1 %v2574_v8  ;;  %2367 = vmatpush3.msra.mxu0 %v2580_v9 }
  0x1d   : > { %2381 = vmatprep.subr.mxu1 %v2486_v1  ;;  %2376 = vmatprep.subr.mxu0 %v2486_v1 }
  0xe5   : > { %v309_v11 = vpop.f32.mrb[0].mxu0  ;;  %v385_v12 = vpop.f32.mrb[0].mxu1 }
  0xe6   : > { %v310_v13 = vadd.f32 %v2588_v10, %v309_v11  ;;  %v2340_v14 = vpop.f32.mrb[1].mxu0  ;;  %v386_v15 = vadd.f32 %v2588_v10, %v385_v12  ;;  %v2345_v16 = vpop.f32.mrb[1].mxu1 }
  0xe8   : > { %v313_v17 = vmax.f32 %v310_v13, 0.0  ;;  %v389_v18 = vmax.f32 %v386_v15, 0.0 }
  0xe9   : > { %v461_v20 = vpop.f32.mrb[2].mxu0  ;;  %v537_v21 = vpop.f32.mrb[2].mxu1 }
  0xea   : > { %v702_v22 = vrot.slane %v313_v17, 1  ;;  %v922_v23 = vrot.slane %v389_v18, 1  ;;  %2374 = vmatmul.mubr.msk.f32.vlgmr.msra.gmra.mrb[6].mxu1 %vm703_vm3, %v313_v17  ;;  %v462_v25 = vadd.f32 %v2588_v10, %v461_v20  ;;  %v2350_v26 = vpop.f32.mrb[3].mxu0  ;;  %v2355_v27 = vpop.f32.mrb[3].mxu1  ;;  %v538_v34 = vadd.f32 %v2588_v10, %v537_v21 }
  0xeb   : > { %2382 = vmatpush3.msra.mxu1 %v2595_v19  ;;  %2383 = vmatprep.mubr.msk.f32.mxu1 %vm2487_vm1, %v2486_v1 }
  0xec   : > { %2369 = vmatmul.mubr.msk.f32.vlgmr.msra.gmra.mrb[6].mxu0 %vm703_vm3, %v702_v22  ;;  %2391 = vmatprep.subr.mxu1 %v2486_v1  ;;  %v465_v30 = vmax.f32 %v462_v25, 0.0  ;;  %v541_v35 = vmax.f32 %v538_v34, 0.0 }
  0xed   : > { %2377 = vmatpush3.msra.mxu0 %v2601_v24  ;;  %2378 = vmatprep.mubr.msk.f32.mxu0 %vm2487_vm1, %v2486_v1  ;;  %v613_v28 = vpop.f32.mrb[4].mxu0  ;;  %v689_v29 = vpop.f32.mrb[4].mxu1 }
  0xee   : > { %2384 = vmatmul.mubr.msk.f32.vlgmr.msra.gmra.mrb[8].mxu1 %vm703_vm3, %v922_v23  ;;  %2386 = vmatprep.subr.mxu0 %v2486_v1  ;;  %v2360_v31 = vpop.f32.mrb[5].mxu0  ;;  %v2365_v32 = vpop.f32.mrb[5].mxu1  ;;  %v1220_v33 = vrot.slane %v465_v30, 1  ;;  %v1512_v36 = vrot.slane %v541_v35, 1  ;;  %v614_v37 = vadd.f32 %v2588_v10, %v613_v28  ;;  %v690_v40 = vadd.f32 %v2588_v10, %v689_v29 }
  0xef   : > { %2392 = vmatpush3.msra.mxu1 %v2574_v8  ;;  %2393 = vmatprep.mubr.msk.f32.mxu1 %vm2487_vm1, %v2486_v1 }
  0xf0   : > { %2379 = vmatmul.mubr.msk.f32.vlgmr.msra.gmra.mrb[8].mxu0 %vm703_vm3, %v389_v18  ;;  %2401 = vmatprep.subr.mxu1 %v2486_v1  ;;  %v617_v38 = vmax.f32 %v614_v37, 0.0  ;;  %v693_v41 = vmax.f32 %v690_v40, 0.0 }
  0xf1   : > { %2387 = vmatpush3.msra.mxu0 %v2580_v9  ;;  %2388 = vmatprep.mubr.msk.f32.mxu0 %vm2487_vm1, %v2486_v1 }
  0xf2   : > { %2394 = vmatmul.mubr.msk.f32.vlgmr.msra.gmra.mrb[10].mxu1 %vm703_vm3, %v389_v18  ;;  %2396 = vmatprep.subr.mxu0 %v2486_v1  ;;  %v1804_v39 = vrot.slane %v617_v38, 1  ;;  %v2096_v42 = vrot.slane %v693_v41, 1 }
  0xf3   : > { %2402 = vmatpush3.msra.mxu1 %v2595_v19  ;;  %2403 = vmatprep.mubr.msk.f32.mxu1 %vm2487_vm1, %v2486_v1 }
  0xf4   : > { %2389 = vmatmul.mubr.msk.f32.vlgmr.msra.gmra.mrb[10].mxu0 %vm703_vm3, %v922_v23  ;;  %2411 = vmatprep.subr.mxu1 %v2486_v1 }
  0xf5   : > { %2397 = vmatpush3.msra.mxu0 %v2601_v24  ;;  %2398 = vmatprep.mubr.msk.f32.mxu0 %vm2487_vm1, %v2486_v1 }
  0xf6   : > { %2404 = vmatmul.mubr.msk.f32.vlgmr.msra.gmra.mrb[12].mxu1 %vm703_vm3, %v1220_v33  ;;  %2406 = vmatprep.subr.mxu0 %v2486_v1 }
  0xf7   : > { %2412 = vmatpush3.msra.mxu1 %v2574_v8  ;;  %2413 = vmatprep.mubr.msk.f32.mxu1 %vm2487_vm1, %v2486_v1 }
  0xf8   : > { %2399 = vmatmul.mubr.msk.f32.vlgmr.msra.gmra.mrb[12].mxu0 %vm703_vm3, %v465_v30  ;;  %2421 = vmatprep.subr.mxu1 %v2486_v1 }
  0xf9   : > { %2407 = vmatpush3.msra.mxu0 %v2580_v9  ;;  %2408 = vmatprep.mubr.msk.f32.mxu0 %vm2487_vm1, %v2486_v1 }
  0xfa   : > { %2414 = vmatmul.mubr.msk.f32.vlgmr.msra.gmra.mrb[14].mxu1 %vm703_vm3, %v465_v30  ;;  %2416 = vmatprep.subr.mxu0 %v2486_v1 }
  0xfb   : > { %2422 = vmatpush3.msra.mxu1 %v2595_v19  ;;  %2423 = vmatprep.mubr.msk.f32.mxu1 %vm2487_vm1, %v2486_v1 }
  0xfc   : > { %2409 = vmatmul.mubr.msk.f32.vlgmr.msra.gmra.mrb[14].mxu0 %vm703_vm3, %v1220_v33  ;;  %2431 = vmatprep.subr.mxu1 %v2486_v1 }
  0xfd   : > { %2417 = vmatpush3.msra.mxu0 %v2601_v24  ;;  %2418 = vmatprep.mubr.msk.f32.mxu0 %vm2487_vm1, %v2486_v1 }
  0xfe   : > { %2424 = vmatmul.mubr.msk.f32.vlgmr.msra.gmra.mrb[16].mxu1 %vm703_vm3, %v1512_v36  ;;  %2426 = vmatprep.subr.mxu0 %v2486_v1 }
  0xff   : > { %2432 = vmatpush3.msra.mxu1 %v2574_v8  ;;  %2433 = vmatprep.mubr.msk.f32.mxu1 %vm2487_vm1, %v2486_v1 }
 0x100   : > { %2419 = vmatmul.mubr.msk.f32.vlgmr.msra.gmra.mrb[16].mxu0 %vm703_vm3, %v541_v35  ;;  %2441 = vmatprep.subr.mxu1 %v2486_v1 }
 0x101   : > { %2427 = vmatpush3.msra.mxu0 %v2580_v9  ;;  %2428 = vmatprep.mubr.msk.f32.mxu0 %vm2487_vm1, %v2486_v1 }
 0x102   : > { %2434 = vmatmul.mubr.msk.f32.vlgmr.msra.gmra.mrb[18].mxu1 %vm703_vm3, %v541_v35  ;;  %2436 = vmatprep.subr.mxu0 %v2486_v1 }
 0x103   : > { %2442 = vmatpush3.msra.mxu1 %v2595_v19  ;;  %2443 = vmatprep.mubr.msk.f32.mxu1 %vm2487_vm1, %v2486_v1 }
 0x104   : > { %2429 = vmatmul.mubr.msk.f32.vlgmr.msra.gmra.mrb[18].mxu0 %vm703_vm3, %v1512_v36  ;;  %2451 = vmatprep.subr.mxu1 %v2486_v1 }
 0x105   : > { %2437 = vmatpush3.msra.mxu0 %v2601_v24  ;;  %2438 = vmatprep.mubr.msk.f32.mxu0 %vm2487_vm1, %v2486_v1 }
 0x106   : > { %2444 = vmatmul.mubr.msk.f32.vlgmr.msra.gmra.mrb[20].mxu1 %vm703_vm3, %v1804_v39  ;;  %2446 = vmatprep.subr.mxu0 %v2486_v1 }
 0x107   : > { %2452 = vmatpush3.msra.mxu1 %v2574_v8  ;;  %2453 = vmatprep.mubr.msk.f32.mxu1 %vm2487_vm1, %v2486_v1 }
 0x108   : > { %2439 = vmatmul.mubr.msk.f32.vlgmr.msra.gmra.mrb[20].mxu0 %vm703_vm3, %v617_v38  ;;  %2461 = vmatprep.subr.mxu1 %v2486_v1 }
 0x109   : > { %2447 = vmatpush3.msra.mxu0 %v2580_v9  ;;  %2448 = vmatprep.mubr.msk.f32.mxu0 %vm2487_vm1, %v2486_v1 }
 0x10a   : > { %2454 = vmatmul.mubr.msk.f32.vlgmr.msra.gmra.mrb[22].mxu1 %vm703_vm3, %v617_v38  ;;  %2456 = vmatprep.subr.mxu0 %v2486_v1 }
 0x10b   : > { %2462 = vmatpush3.msra.mxu1 %v2595_v19  ;;  %2463 = vmatprep.mubr.msk.f32.mxu1 %vm2487_vm1, %v2486_v1 }
 0x10c   : > { %2449 = vmatmul.mubr.msk.f32.vlgmr.msra.gmra.mrb[22].mxu0 %vm703_vm3, %v1804_v39 }
 0x10d   : > { %2457 = vmatpush3.msra.mxu0 %v2601_v24  ;;  %2458 = vmatprep.mubr.msk.f32.mxu0 %vm2487_vm1, %v2486_v1 }
 0x10e   : > { %2464 = vmatmul.mubr.msk.f32.vlgmr.msra.gmra.mrb[24].mxu1 %vm703_vm3, %v2096_v42 }
 0x110   : > { %2459 = vmatmul.mubr.msk.f32.vlgmr.msra.gmra.mrb[24].mxu0 %vm703_vm3, %v693_v41 }
 0x1bd   : > { %v844_v43 = vpop.f32.mrb[6].mxu1 }
 0x1be   : > { %v2375_v44 = vpop.f32.mrb[7].mxu1 }
 0x1bf   : > { %v772_v45 = vpop.f32.mrb[6].mxu0 }
 0x1c0   : > { %v845_v46 = vadd.f32 %v844_v43, %v772_v45  ;;  %v2370_v47 = vpop.f32.mrb[7].mxu0 }
 0x1c1   : > { %v991_v48 = vpop.f32.mrb[8].mxu1 }
 0x1c2   : > { %v2385_v49 = vpop.f32.mrb[9].mxu1 }
 0x1c3   : > { %v917_v50 = vpop.f32.mrb[8].mxu0 }
 0x1c4   : > { %v921_v51 = vadd.f32 %v917_v50, %v845_v46  ;;  %v2380_v52 = vpop.f32.mrb[9].mxu0 }
 0x1c5   : > { %v1142_v54 = vpop.f32.mrb[10].mxu1 }
 0x1c6   : > { %v995_v55 = vadd.f32 %v991_v48, %v921_v51  ;;  %v2395_v56 = vpop.f32.mrb[11].mxu1 }
 0x1c7   : > { %v1072_v57 = vpop.f32.mrb[10].mxu0 }
 0x1c8   : > { %v1002_v58 = vadd.f32 %v2261_v53, %v995_v55  ;;  %v1143_v59 = vadd.f32 %v1142_v54, %v1072_v57  ;;  %v2390_v60 = vpop.f32.mrb[11].mxu0 }
 0x1c9   : > { %v1289_v61 = vpop.f32.mrb[12].mxu1 }
 0x1ca   : > { %v1003_v62 = vmax.f32 %v1002_v58, 0.0  ;;  %v2405_v63 = vpop.f32.mrb[13].mxu1 }
 0x1cb   : > { %v1215_v0 = vpop.f32.mrb[12].mxu0 }
 0x1cc   : > { %1005 = vst.msk [vmem:[%s2703_s16] sm:$0x1f] %vm1004_vm4, %v1003_v62  ;;  %v1219_v1 = vadd.f32 %v1215_v0, %v1143_v59  ;;  %v2400_v2 = vpop.f32.mrb[13].mxu0 }
 0x1cd   : > { %v1434_v3 = vpop.f32.mrb[14].mxu1 }
 0x1ce   : > { %v1293_v4 = vadd.f32 %v1289_v61, %v1219_v1  ;;  %v2415_v5 = vpop.f32.mrb[15].mxu1 }
 0x1cf   : > { %v1364_v6 = vpop.f32.mrb[14].mxu0 }
 0x1d0   : > { %v1294_v7 = vadd.f32 %v2261_v53, %v1293_v4  ;;  %v1435_v8 = vadd.f32 %v1434_v3, %v1364_v6  ;;  %v2410_v9 = vpop.f32.mrb[15].mxu0 }
 0x1d1   : > { %v1581_v10 = vpop.f32.mrb[16].mxu1 }
 0x1d2   : > { %v1295_v11 = vmax.f32 %v1294_v7, 0.0  ;;  %v2425_v12 = vpop.f32.mrb[17].mxu1 }
 0x1d3   : > { %v1507_v13 = vpop.f32.mrb[16].mxu0 }
 0x1d4   : > { %2266 = vst.msk [vmem:[%s2703_s16 + $0x8] sm:$0x1f] %vm1004_vm4, %v1295_v11  ;;  %v1511_v14 = vadd.f32 %v1507_v13, %v1435_v8  ;;  %v2420_v15 = vpop.f32.mrb[17].mxu0 }
 0x1d5   : > { %v1726_v16 = vpop.f32.mrb[18].mxu1 }
 0x1d6   : > { %v1585_v17 = vadd.f32 %v1581_v10, %v1511_v14  ;;  %v2435_v18 = vpop.f32.mrb[19].mxu1 }
 0x1d7   : > { %v1656_v19 = vpop.f32.mrb[18].mxu0 }
 0x1d8   : > { %v1586_v20 = vadd.f32 %v2261_v53, %v1585_v17  ;;  %v1727_v21 = vadd.f32 %v1726_v16, %v1656_v19  ;;  %v2430_v22 = vpop.f32.mrb[19].mxu0 }
 0x1d9   : > { %v1873_v23 = vpop.f32.mrb[20].mxu1 }
 0x1da   : > { %v1587_v24 = vmax.f32 %v1586_v20, 0.0  ;;  %v2445_v25 = vpop.f32.mrb[21].mxu1 }
 0x1db   : > { %v1799_v26 = vpop.f32.mrb[20].mxu0 }
 0x1dc   : > { %2271 = vst.msk [vmem:[%s2703_s16 + $0x10] sm:$0x1f] %vm1004_vm4, %v1587_v24  ;;  %v1803_v27 = vadd.f32 %v1799_v26, %v1727_v21  ;;  %v2440_v28 = vpop.f32.mrb[21].mxu0 }
 0x1dd   : > { %v2018_v29 = vpop.f32.mrb[22].mxu1 }
 0x1de   : > { %v1877_v30 = vadd.f32 %v1873_v23, %v1803_v27  ;;  %v2455_v31 = vpop.f32.mrb[23].mxu1 }
 0x1df   : > { %v1948_v32 = vpop.f32.mrb[22].mxu0 }
 0x1e0   : > { %v1878_v33 = vadd.f32 %v2261_v53, %v1877_v30  ;;  %v2019_v34 = vadd.f32 %v2018_v29, %v1948_v32  ;;  %v2450_v35 = vpop.f32.mrb[23].mxu0 }
 0x1e1   : > { %v2165_v36 = vpop.f32.mrb[24].mxu1 }
 0x1e2   : > { %v1879_v37 = vmax.f32 %v1878_v33, 0.0  ;;  %v2465_v38 = vpop.f32.mrb[25].mxu1 }
 0x1e3   : > { %v2091_v39 = vpop.f32.mrb[24].mxu0 }
 0x1e4   : > { %2276 = vst.msk [vmem:[%s2703_s16 + $0x18] sm:$0x1f] %vm1004_vm4, %v1879_v37  ;;  %v2095_v40 = vadd.f32 %v2091_v39, %v2019_v34  ;;  %v2460_v41 = vpop.f32.mrb[25].mxu0 }
 0x1e6   : > { %v2169_v42 = vadd.f32 %v2165_v36, %v2095_v40 }
 0x1e8   : > { %v2170_v43 = vadd.f32 %v2261_v53, %v2169_v42 }
 0x1ea   : > { %v2171_v44 = vmax.f32 %v2170_v43, 0.0 }
 0x1ec   : > { %2281 = vst.msk [vmem:[%s2703_s16 + $0x20] sm:$0x1f] %vm1004_vm4, %v2171_v44 }
 0x1ed PF: > { %s15_s18 = sadd.s32 1, %s2484_s18  }
 0x1ee   : > { %p12_p4 = scmp.ge.s32.totalorder %s15_s18, 4  }
 0x1f0   :  { %14 = sbr.rel (!%p12_p4) target bundleno = 1 (0x1), region = 82 }

</bundles_post_ra>
